<compile_context>
chip_gen: v7x
topology: tpu7x:2x2x1
jax: 0.10.0
libtpu: 0.0.40
codegen_flags: <defaults>
</compile_context>

<pallas_src>
import functools

import jax
import jax.numpy as jnp
from jax.experimental import pallas as pl
from jax.experimental.pallas import tpu as pltpu


def _round_up(x, m):
    return (x + m - 1) // m * m


def _tensorcores_per_chip():
    """Best-effort device query: v7x has 2 TensorCores/chip, older gens 1."""
    try:
        kind = (getattr(jax.devices()[0], "device_kind", "") or "").lower()
        return 2 if "v7" in kind else 1
    except Exception:
        return 1


def _choose_tile_b(batch, tile_b=None):
    b16 = _round_up(max(batch, 1), 16)
    if tile_b is None:
        # One big 16-aligned tile (grid is a serial loop on single-TC chips),
        # capped at 512 rows of batch per step.
        tile_b = min(b16, 512)
        if _tensorcores_per_chip() >= 2 and b16 >= 32:
            # v7x: make sure there are >= 2 grid steps so the "parallel"
            # batch axis is sharded across both TensorCores.
            tile_b = min(tile_b, _round_up((b16 + 1) // 2, 16))
    return max(16, _round_up(tile_b, 16))


def cbow_mlp_kernel(x_ref, w1_ref, b1_ref, w2_ref, b2_ref, w3_ref, b3_ref,
                    out_ref):
    # linear_1 (+ relu): single K=2E_pad matmul (concat done in the wrapper).
    h1 = jnp.dot(x_ref[...], w1_ref[...], preferred_element_type=jnp.float32)
    h1 = jnp.maximum(h1 + b1_ref[...], 0.0)

    # linear_2 (+ relu): bf16 MXU operands, f32 accumulate / elementwise.
    h2 = jnp.dot(h1.astype(jnp.bfloat16), w2_ref[...],
                 preferred_element_type=jnp.float32)
    h2 = jnp.maximum(h2 + b2_ref[...], 0.0)

    # linear_3 (dropout is identity in eval mode). Padded label columns carry
    # a -1e30 bias (mask baked into b3 by the wrapper), padded w3 columns are
    # zero, so no in-kernel masking is needed.
    logits = jnp.dot(h2.astype(jnp.bfloat16), w3_ref[...],
                     preferred_element_type=jnp.float32) + b3_ref[...]

    # log_softmax over labels (dim=1), matching F.log_softmax on 2-D input.
    m = jnp.max(logits, axis=-1, keepdims=True)
    shifted = logits - m
    lse = jnp.log(jnp.sum(jnp.exp(shifted), axis=-1, keepdims=True))
    out_ref[...] = shifted - lse


def cbow_mlp_forward(prem_ids, hypo_ids, params, *, tile_b=None):
    """prem_ids, hypo_ids: (B, L) int32 token ids."""
    embed = params["embed"]              # (V, E) f32
    w1, b1 = params["w1"], params["b1"]  # (2E, H), (1, H)
    w2, b2 = params["w2"], params["b2"]  # (H, H),  (1, H)
    w3, b3 = params["w3"], params["b3"]  # (H, C),  (1, C)

    E = embed.shape[1]
    H = w1.shape[1]
    C = w3.shape[1]
    B = prem_ids.shape[0]

    K = 2 * E
    K_PAD = _round_up(K, 128)   # lane-dense contraction dim for linear_1
    H_PAD = _round_up(H, 128)   # lane-dense hidden dim
    C_PAD = _round_up(C, 128)   # lane-dense output dim (unmasked vst)

    # --- Glue: bf16 gather + f32 mean pool + concat (collapses L before the
    #     kernel; XLA fuses gather + reduce; bf16 table halves gather bytes).
    embed_bf16 = embed.astype(jnp.bfloat16)
    emb_prem = jnp.mean(jnp.take(embed_bf16, prem_ids, axis=0), axis=1,
                        dtype=jnp.float32)                    # (B, E) f32
    emb_hypo = jnp.mean(jnp.take(embed_bf16, hypo_ids, axis=0), axis=1,
                        dtype=jnp.float32)                    # (B, E) f32
    x = jnp.concatenate([emb_prem, emb_hypo], axis=1).astype(jnp.bfloat16)

    # --- Batch tiling (multiple of 16 for bf16 sublane packing) ---
    tile_b = _choose_tile_b(B, tile_b)
    B_pad = _round_up(B, tile_b)
    x = jnp.pad(x, ((0, B_pad - B), (0, K_PAD - K)))           # (B_pad, K_PAD)

    # --- Weight prep: zero-pad to lane-dense shapes, bf16 matmul operands,
    #     f32 biases. Zero padding is exact (ReLU(0)=0, zero rows/cols of
    #     w2/w3 contribute nothing).
    w1_p = jnp.pad(w1, ((0, K_PAD - K), (0, H_PAD - H))).astype(jnp.bfloat16)
    b1_p = jnp.pad(b1, ((0, 0), (0, H_PAD - H)))
    w2_p = jnp.pad(w2, ((0, H_PAD - H), (0, H_PAD - H))).astype(jnp.bfloat16)
    b2_p = jnp.pad(b2, ((0, 0), (0, H_PAD - H)))
    w3_p = jnp.pad(w3, ((0, H_PAD - H), (0, C_PAD - C))).astype(jnp.bfloat16)
    # Bake the padded-label mask into b3: padded columns get -1e30 so they
    # vanish under the max-shifted log-softmax.
    if C_PAD != C:
        b3_p = jnp.concatenate(
            [b3, jnp.full((1, C_PAD - C), -1e30, jnp.float32)], axis=1)
    else:
        b3_p = b3

    grid = (B_pad // tile_b,)
    const2 = lambda b: (0, 0)

    # VMEM budget: resident weights/biases + double-buffered batch tiles,
    # with headroom, kept below v7x's 64 MiB/TC.
    weight_bytes = (K_PAD * H_PAD + H_PAD * H_PAD + H_PAD * C_PAD) * 2 \
        + (2 * H_PAD + C_PAD) * 4
    act_bytes = tile_b * K_PAD * 2 + tile_b * C_PAD * 4
    vmem_limit = int(min(max(2 * (weight_bytes + act_bytes) + (2 << 20),
                             32 << 20), 60 << 20))

    flops = 2 * B_pad * (K_PAD * H_PAD + H_PAD * H_PAD + H_PAD * C_PAD)
    bytes_accessed = B_pad * K_PAD * 2 + weight_bytes + B_pad * C_PAD * 4
    cost = pl.CostEstimate(flops=flops,
                           transcendentals=B_pad * C_PAD,
                           bytes_accessed=bytes_accessed)

    out = pl.pallas_call(
        cbow_mlp_kernel,
        out_shape=jax.ShapeDtypeStruct((B_pad, C_PAD), jnp.float32),
        grid=grid,
        in_specs=[
            pl.BlockSpec((tile_b, K_PAD), lambda b: (b, 0)),   # x (batch tile)
            pl.BlockSpec((K_PAD, H_PAD), const2),              # w1 (resident)
            pl.BlockSpec((1, H_PAD), const2),                  # b1
            pl.BlockSpec((H_PAD, H_PAD), const2),              # w2 (resident)
            pl.BlockSpec((1, H_PAD), const2),                  # b2
            pl.BlockSpec((H_PAD, C_PAD), const2),              # w3 (resident)
            pl.BlockSpec((1, C_PAD), const2),                  # b3 (masked pad)
        ],
        out_specs=pl.BlockSpec((tile_b, C_PAD), lambda b: (b, 0)),
        compiler_params=pltpu.CompilerParams(
            dimension_semantics=("parallel",),
            vmem_limit_bytes=vmem_limit,
        ),
        cost_estimate=cost,
    )(x, w1_p, b1_p, w2_p, b2_p, w3_p, b3_p)

    return out[:B, :C]


def init_params(key, vocab_size, embedding_dim, hidden_dim, num_labels):
    """Mirrors CBOW_MLP.init_weights: uniform(-0.1, 0.1) weights, zero biases.
    Kernel weights are stored as (in, out) = transpose of nn.Linear.weight."""
    initrange = 0.1
    ks = jax.random.split(key, 4)
    embed = jax.random.uniform(ks[0], (vocab_size, embedding_dim),
                               minval=-initrange, maxval=initrange,
                               dtype=jnp.float32)
    w1 = jax.random.uniform(ks[1], (2 * embedding_dim, hidden_dim),
                            minval=-initrange, maxval=initrange,
                            dtype=jnp.float32)
    w2 = jax.random.uniform(ks[2], (hidden_dim, hidden_dim),
                            minval=-initrange, maxval=initrange,
                            dtype=jnp.float32)
    w3 = jax.random.uniform(ks[3], (hidden_dim, num_labels),
                            minval=-initrange, maxval=initrange,
                            dtype=jnp.float32)
    return {
        "embed": embed,
        "w1": w1, "b1": jnp.zeros((1, hidden_dim), jnp.float32),
        "w2": w2, "b2": jnp.zeros((1, hidden_dim), jnp.float32),
        "w3": w3, "b3": jnp.zeros((1, num_labels), jnp.float32),
    }


if __name__ == "__main__":
    # Small shapes consistent with the forward pass.
    vocab_size, embedding_dim, hidden_dim, num_labels = 50, 32, 32, 4
    batch, seq_len = 8, 8

    key = jax.random.PRNGKey(0)
    pkey, k_prem, k_hypo = jax.random.split(key, 3)

    params = init_params(pkey, vocab_size, embedding_dim, hidden_dim,
                         num_labels)

    prem = jax.random.randint(k_prem, (batch, seq_len), 0, vocab_size,
                              dtype=jnp.int32)
    hypo = jax.random.randint(k_hypo, (batch, seq_len), 0, vocab_size,
                              dtype=jnp.int32)

    out = cbow_mlp_forward(prem, hypo, params)
    jax.block_until_ready(out)

    # Sanity checks: shape, log_softmax normalization, and agreement with a
    # pure-JAX f32 reference of the same forward pass (bf16 MXU tolerance).
    assert out.shape == (batch, num_labels)
    assert jnp.allclose(jnp.sum(jnp.exp(out), axis=-1), 1.0, atol=1e-3)

    def ref_forward(prem_ids, hypo_ids, p):
        ep = jnp.take(p["embed"], prem_ids, axis=0).mean(1)
        eh = jnp.take(p["embed"], hypo_ids, axis=0).mean(1)
        x = jnp.concatenate([ep, eh], axis=1)
        h1 = jnp.maximum(x @ p["w1"] + p["b1"], 0.0)
        h2 = jnp.maximum(h1 @ p["w2"] + p["b2"], 0.0)
        logits = h2 @ p["w3"] + p["b3"]
        return jax.nn.log_softmax(logits, axis=-1)

    ref = ref_forward(prem, hypo, params)
    assert jnp.max(jnp.abs(out - ref)) < 5e-2  # bf16 operands vs f32 ref

    print("KERNEL_OK")
</pallas_src>

<mosaic_0001>
module attributes {stable_mosaic.version = 11 : i64} {
  func.func @cbow_mlp_kernel(%arg0: i32, %arg1: memref<16x128xbf16, #tpu.memory_space<vmem>>, %arg2: memref<128x128xbf16, #tpu.memory_space<vmem>>, %arg3: memref<1x128xf32, #tpu.memory_space<vmem>>, %arg4: memref<128x128xbf16, #tpu.memory_space<vmem>>, %arg5: memref<1x128xf32, #tpu.memory_space<vmem>>, %arg6: memref<128x128xbf16, #tpu.memory_space<vmem>>, %arg7: memref<1x128xf32, #tpu.memory_space<vmem>>, %arg8: memref<16x128xf32, #tpu.memory_space<vmem>>) attributes {dimension_semantics = [#tpu.dimension_semantics<parallel>], iteration_bounds = array<i64: 1>, scalar_prefetch = 0 : i64, scratch_operands = 0 : i64, tpu.core_type = #tpu.core_type<tc>, window_params = [{transform_indices = @transform_0, window_bounds = array<i64: 16, 128>}, {pipeline_mode = #tpu.pipeline_mode<synchronous>, transform_indices = @transform_1, window_bounds = array<i64: 128, 128>}, {pipeline_mode = #tpu.pipeline_mode<synchronous>, transform_indices = @transform_2, window_bounds = array<i64: 1, 128>}, {pipeline_mode = #tpu.pipeline_mode<synchronous>, transform_indices = @transform_3, window_bounds = array<i64: 128, 128>}, {pipeline_mode = #tpu.pipeline_mode<synchronous>, transform_indices = @transform_4, window_bounds = array<i64: 1, 128>}, {pipeline_mode = #tpu.pipeline_mode<synchronous>, transform_indices = @transform_5, window_bounds = array<i64: 128, 128>}, {pipeline_mode = #tpu.pipeline_mode<synchronous>, transform_indices = @transform_6, window_bounds = array<i64: 1, 128>}, {transform_indices = @transform_7, window_bounds = array<i64: 16, 128>}]} {
    %c0 = arith.constant 0 : index
    %c0_0 = arith.constant 0 : index
    %0 = vector.load %arg1[%c0, %c0_0] : memref<16x128xbf16, #tpu.memory_space<vmem>>, vector<16x128xbf16>
    %c0_1 = arith.constant 0 : index
    %c0_2 = arith.constant 0 : index
    %1 = vector.load %arg2[%c0_1, %c0_2] : memref<128x128xbf16, #tpu.memory_space<vmem>>, vector<128x128xbf16>
    %cst = arith.constant dense<0.000000e+00> : vector<16x128xf32>
    %2 = tpu.matmul %0, %1, %cst {dimension_numbers = #tpu.dot_dimension_numbers<[1], [0], [0], [1], [0, 0, 1, 1], [], []>} : vector<16x128xbf16>, vector<128x128xbf16>, vector<16x128xf32> -> vector<16x128xf32>
    %c0_3 = arith.constant 0 : index
    %c0_4 = arith.constant 0 : index
    %3 = vector.load %arg3[%c0_3, %c0_4] : memref<1x128xf32, #tpu.memory_space<vmem>>, vector<1x128xf32>
    %4 = vector.broadcast %3 : vector<1x128xf32> to vector<16x128xf32>
    %5 = arith.addf %2, %4 : vector<16x128xf32>
    %cst_5 = arith.constant 0.000000e+00 : f32
    %6 = vector.broadcast %cst_5 : f32 to vector<16x128xf32>
    %7 = arith.maximumf %5, %6 : vector<16x128xf32>
    %8 = arith.truncf %7 : vector<16x128xf32> to vector<16x128xbf16>
    %c0_6 = arith.constant 0 : index
    %c0_7 = arith.constant 0 : index
    %9 = vector.load %arg4[%c0_6, %c0_7] : memref<128x128xbf16, #tpu.memory_space<vmem>>, vector<128x128xbf16>
    %cst_8 = arith.constant dense<0.000000e+00> : vector<16x128xf32>
    %10 = tpu.matmul %8, %9, %cst_8 {dimension_numbers = #tpu.dot_dimension_numbers<[1], [0], [0], [1], [0, 0, 1, 1], [], []>} : vector<16x128xbf16>, vector<128x128xbf16>, vector<16x128xf32> -> vector<16x128xf32>
    %c0_9 = arith.constant 0 : index
    %c0_10 = arith.constant 0 : index
    %11 = vector.load %arg5[%c0_9, %c0_10] : memref<1x128xf32, #tpu.memory_space<vmem>>, vector<1x128xf32>
    %12 = vector.broadcast %11 : vector<1x128xf32> to vector<16x128xf32>
    %13 = arith.addf %10, %12 : vector<16x128xf32>
    %cst_11 = arith.constant 0.000000e+00 : f32
    %14 = vector.broadcast %cst_11 : f32 to vector<16x128xf32>
    %15 = arith.maximumf %13, %14 : vector<16x128xf32>
    %16 = arith.truncf %15 : vector<16x128xf32> to vector<16x128xbf16>
    %c0_12 = arith.constant 0 : index
    %c0_13 = arith.constant 0 : index
    %17 = vector.load %arg6[%c0_12, %c0_13] : memref<128x128xbf16, #tpu.memory_space<vmem>>, vector<128x128xbf16>
    %cst_14 = arith.constant dense<0.000000e+00> : vector<16x128xf32>
    %18 = tpu.matmul %16, %17, %cst_14 {dimension_numbers = #tpu.dot_dimension_numbers<[1], [0], [0], [1], [0, 0, 1, 1], [], []>} : vector<16x128xbf16>, vector<128x128xbf16>, vector<16x128xf32> -> vector<16x128xf32>
    %c0_15 = arith.constant 0 : index
    %c0_16 = arith.constant 0 : index
    %19 = vector.load %arg7[%c0_15, %c0_16] : memref<1x128xf32, #tpu.memory_space<vmem>>, vector<1x128xf32>
    %20 = vector.broadcast %19 : vector<1x128xf32> to vector<16x128xf32>
    %21 = arith.addf %18, %20 : vector<16x128xf32>
    %cst_17 = arith.constant dense<0xFF800000> : vector<16xf32>
    %22 = vector.multi_reduction <maximumf>, %21, %cst_17 [1] : vector<16x128xf32> to vector<16xf32>
    %23 = vector.shape_cast %22 : vector<16xf32> to vector<16x1xf32>
    %24 = vector.broadcast %23 : vector<16x1xf32> to vector<16x128xf32>
    %25 = arith.subf %21, %24 : vector<16x128xf32>
    %26 = math.exp %25 : vector<16x128xf32>
    %cst_18 = arith.constant dense<0.000000e+00> : vector<16xf32>
    %27 = vector.multi_reduction <add>, %26, %cst_18 [1] : vector<16x128xf32> to vector<16xf32>
    %28 = vector.shape_cast %27 : vector<16xf32> to vector<16x1xf32>
    %29 = math.log %28 : vector<16x1xf32>
    %30 = vector.broadcast %29 : vector<16x1xf32> to vector<16x128xf32>
    %31 = arith.subf %25, %30 : vector<16x128xf32>
    %c0_19 = arith.constant 0 : index
    %c0_20 = arith.constant 0 : index
    %32 = vector.load %arg8[%c0_19, %c0_20] : memref<16x128xf32, #tpu.memory_space<vmem>>, vector<16x128xf32>
    tpu.vector_store %arg8[%c0_19, %c0_20], %31 {strides = array<i32>} : memref<16x128xf32, #tpu.memory_space<vmem>>, vector<16x128xf32>,
    return
  }
  func.func @transform_0(%arg0: i32) -> (i32, i32) {
    %c0_i32 = arith.constant 0 : i32
    %c0_i32_0 = arith.constant 0 : i32
    return %arg0, %c0_i32 : i32, i32
  }
  func.func @transform_1(%arg0: i32) -> (i32, i32) {
    %c0_i32 = arith.constant 0 : i32
    %c0_i32_0 = arith.constant 0 : i32
    %c0_i32_1 = arith.constant 0 : i32
    return %c0_i32, %c0_i32_0 : i32, i32
  }
  func.func @transform_2(%arg0: i32) -> (i32, i32) {
    %c0_i32 = arith.constant 0 : i32
    %c0_i32_0 = arith.constant 0 : i32
    %c0_i32_1 = arith.constant 0 : i32
    return %c0_i32, %c0_i32_0 : i32, i32
  }
  func.func @transform_3(%arg0: i32) -> (i32, i32) {
    %c0_i32 = arith.constant 0 : i32
    %c0_i32_0 = arith.constant 0 : i32
    %c0_i32_1 = arith.constant 0 : i32
    return %c0_i32, %c0_i32_0 : i32, i32
  }
  func.func @transform_4(%arg0: i32) -> (i32, i32) {
    %c0_i32 = arith.constant 0 : i32
    %c0_i32_0 = arith.constant 0 : i32
    %c0_i32_1 = arith.constant 0 : i32
    return %c0_i32, %c0_i32_0 : i32, i32
  }
  func.func @transform_5(%arg0: i32) -> (i32, i32) {
    %c0_i32 = arith.constant 0 : i32
    %c0_i32_0 = arith.constant 0 : i32
    %c0_i32_1 = arith.constant 0 : i32
    return %c0_i32, %c0_i32_0 : i32, i32
  }
  func.func @transform_6(%arg0: i32) -> (i32, i32) {
    %c0_i32 = arith.constant 0 : i32
    %c0_i32_0 = arith.constant 0 : i32
    %c0_i32_1 = arith.constant 0 : i32
    return %c0_i32, %c0_i32_0 : i32, i32
  }
  func.func @transform_7(%arg0: i32) -> (i32, i32) {
    %c0_i32 = arith.constant 0 : i32
    %c0_i32_0 = arith.constant 0 : i32
    return %arg0, %c0_i32 : i32, i32
  }
}

</mosaic_0001>

<bundles_post_ra>
// kernel: tpu_custom_call.1
= control target key start
LH: loop header
LB: loop body
LE: loop exit
PB: predicated region body
PF: predicated region fallthrough
CT: control target
= control target key end

     0   :  { %12 = vsyncpa [#allocation3], 0  ;;  %s927_s0 = inlined_call_operand.hbm [shape: bf16[16,128], index: 0, kind: input, shape index: {}]   ;;  %s928_s1 = inlined_call_operand.hbm [shape: bf16[128,128], index: 1, kind: input, shape index: {}]   ;;  %s929_s2 = inlined_call_operand.vmem [shape: f32[1,128], index: 2, kind: input, shape index: {}]   ;;  %s930_s3 = inlined_call_operand.hbm [shape: bf16[128,128], index: 3, kind: input, shape index: {}]   ;;  %s931_s4 = inlined_call_operand.vmem [shape: f32[1,128], index: 4, kind: input, shape index: {}]   ;;  %s932_s5 = inlined_call_operand.hbm [shape: bf16[128,128], index: 5, kind: input, shape index: {}]   ;;  %s933_s6 = inlined_call_operand.vmem [shape: f32[1,128], index: 6, kind: input, shape index: {}]   ;;  %s934_s7 = inlined_call_operand.hbm [shape: f32[16,128], index: 7, kind: output, shape index: {}]  }
   0x1   :  { %13 = vsyncpa [#allocation6], 0 }
   0x2   :  { %14 = vsyncpa [#allocation9], 0 }
   0x3   :  { %15 = vsyncpa [#allocation4], 0  ;;  %s751_s24 = smov [#allocation5]   ;;  %s752_s26 = smov [#allocation2]  }
   0x4   :  { %s33_s25 = sshll.u32 %s751_s24, 4  ;;  %s21_s27 = sshll.u32 %s752_s26, 4  ;;  %s34_s25 = int_to_ptr.vmem [resolvable:$true] %s33_s25  ;;  %s802_s27 = int_to_ptr.vmem [resolvable:$true] %s21_s27 }
   0x5   :  { %s633_s30 = scalar_lea.hbm %s928_s1, 1024 }
   0x6   :  { %p634_p0 = scmp.ne.s32.totalorder %s928_s1, %s633_s30  ;;  %p637_p1 = scmp.lt.u32.totalorder %s633_s30, %s928_s1 }
   0x8   :  { %p639_p2 = pnand %p637_p1, %p634_p0 }
   0xa   :  { %642 = shalt.err (!%p639_p2)
}
   0xb   :  { %s643_s12 = scalar_lea.vmem %s34_s25, 1024  ;;  %p648_p4 = scmp.lt.s32.totalorder %s34_s25, %s34_s25 }
   0xc   :  { %p644_p3 = scmp.ne.s32.totalorder %s34_s25, %s643_s12  ;;  %p649_p5 = scmp.lt.s32.totalorder %s643_s12, %s643_s12 }
   0xe   :  { %p650_p6 = por %p649_p5, %p648_p4 }
  0x10   :  { %p651_p7 = pnand %p650_p6, %p644_p3 }
  0x12   :  { %654 = shalt.err (!%p651_p7)
}
  0x13   :  { %s753_s13 = smov 64   ;;  %s754_s14 = smov 4  }
  0x14   :  { %39 = dma.hbm_to_vmem [thread:$0]  %s928_s1, 1024, %s34_s25, [#allocation6], %s753_s13, %s753_s13, %s754_s14  }
  0x15   :  { %s655_s19 = scalar_lea.hbm %s927_s0, 128 }
  0x16   :  { %p656_p8 = scmp.ne.s32.totalorder %s927_s0, %s655_s19  ;;  %p659_p9 = scmp.lt.u32.totalorder %s655_s19, %s927_s0 }
  0x18   :  { %p661_p10 = pnand %p659_p9, %p656_p8 }
  0x1a   :  { %664 = shalt.err (!%p661_p10)
}
  0x1b   :  { %s665_s24 = scalar_lea.vmem %s802_s27, 128  ;;  %p670_p12 = scmp.lt.s32.totalorder %s802_s27, %s802_s27 }
  0x1c   :  { %p666_p11 = scmp.ne.s32.totalorder %s802_s27, %s665_s24  ;;  %p671_p13 = scmp.lt.s32.totalorder %s665_s24, %s665_s24 }
  0x1e   :  { %p672_p0 = por %p671_p13, %p670_p12 }
  0x20   :  { %p673_p1 = pnand %p672_p0, %p666_p11 }
  0x22   :  { %676 = shalt.err (!%p673_p1)
}
  0x23   :  { %27 = dma.hbm_to_vmem [thread:$0]  %s927_s0, 128, %s802_s27, [#allocation3], %s753_s13, %s753_s13, %s754_s14  }
  0x24   :  { %s755_s26 = smov [#allocation7]   ;;  %s756_s29 = smov [#allocation8]  }
  0x25   :  { %s47_s28 = sshll.u32 %s755_s26, 4  ;;  %s61_s30 = sshll.u32 %s756_s29, 4  ;;  %s48_s28 = int_to_ptr.vmem [resolvable:$true] %s47_s28  ;;  %s839_s30 = int_to_ptr.vmem [resolvable:$true] %s61_s30 }
  0x26   :  { %s677_s10 = scalar_lea.hbm %s930_s3, 1024 }
  0x27   :  { %p678_p2 = scmp.ne.s32.totalorder %s930_s3, %s677_s10  ;;  %p681_p3 = scmp.lt.u32.totalorder %s677_s10, %s930_s3 }
  0x29   :  { %p683_p4 = pnand %p681_p3, %p678_p2 }
  0x2b   :  { %686 = shalt.err (!%p683_p4)
}
  0x2c   :  { %s687_s0 = scalar_lea.vmem %s48_s28, 1024  ;;  %p692_p6 = scmp.lt.s32.totalorder %s48_s28, %s48_s28 }
  0x2d   :  { %p688_p5 = scmp.ne.s32.totalorder %s48_s28, %s687_s0  ;;  %p693_p7 = scmp.lt.s32.totalorder %s687_s0, %s687_s0 }
  0x2f   :  { %p694_p8 = por %p693_p7, %p692_p6 }
  0x31   :  { %p695_p9 = pnand %p694_p8, %p688_p5 }
  0x33   :  { %698 = shalt.err (!%p695_p9)
}
  0x34   :  { %53 = dma.hbm_to_vmem [thread:$0]  %s930_s3, 1024, %s48_s28, [#allocation6], %s753_s13, %s753_s13, %s754_s14  }
  0x35   :  { %s699_s20 = scalar_lea.hbm %s932_s5, 1024 }
  0x36   :  { %p700_p10 = scmp.ne.s32.totalorder %s932_s5, %s699_s20  ;;  %p703_p11 = scmp.lt.u32.totalorder %s699_s20, %s932_s5 }
  0x38   :  { %p705_p12 = pnand %p703_p11, %p700_p10 }
  0x3a   :  { %708 = shalt.err (!%p705_p12)
}
  0x3b   :  { %s709_s1 = scalar_lea.vmem %s839_s30, 1024  ;;  %p714_p0 = scmp.lt.s32.totalorder %s839_s30, %s839_s30 }
  0x3c   :  { %p710_p13 = scmp.ne.s32.totalorder %s839_s30, %s709_s1  ;;  %p715_p1 = scmp.lt.s32.totalorder %s709_s1, %s709_s1 }
  0x3e   :  { %p716_p2 = por %p715_p1, %p714_p0 }
  0x40   :  { %p717_p3 = pnand %p716_p2, %p710_p13 }
  0x42   :  { %720 = shalt.err (!%p717_p3)
}
  0x43   :  { %67 = dma.hbm_to_vmem [thread:$0]  %s932_s5, 1024, %s839_s30, [#allocation9], %s753_s13, %s753_s13, %s754_s14  }
  0x44   :  { %743 = dma.done.wait [#allocation3], 128  }
  0x45   :  { %744 = vsyncadd [#allocation3], 4294967168 }
  0x46   :  { %745 = dma.done.wait [#allocation6], 2048  }
  0x47   :  { %746 = vsyncadd [#allocation6], 4294965248 }
  0x48   :  { %747 = dma.done.wait [#allocation9], 1024  }
  0x49   :  { %748 = vsyncadd [#allocation9], 4294966272  ;;  %v757_v0 = vmov 0.0   ;;  %vm758_vm0 = vmmov 0   ;;  %v600_v1 = vld [vmem:[#allocation5] sm:$0xff]   ;;  %v601_v2 = vld [vmem:[#allocation5 + $0x8] sm:$0xff]  }
  0x4a   :  { %529 = vmatprep.subr.bf16.mxu0 %v757_v0  ;;  %545 = vmatprep.mubr.msk.bf16.mxu0 %vm758_vm0, %v757_v0  ;;  %v602_v3 = vld [vmem:[#allocation5 + $0x10] sm:$0xff]   ;;  %v609_v4 = vld [vmem:[#allocation7] sm:$0xff]   ;;  %v603_v5 = vld [vmem:[#allocation5 + $0x18] sm:$0xff]  }
  0x4b   :  { %549 = vmatprep.subr.bf16.mxu1 %v757_v0  ;;  %565 = vmatprep.mubr.msk.bf16.mxu1 %vm758_vm0, %v757_v0  ;;  %v610_v6 = vld [vmem:[#allocation7 + $0x8] sm:$0xff]   ;;  %v604_v7 = vld [vmem:[#allocation5 + $0x20] sm:$0xff]   ;;  %v611_v8 = vld [vmem:[#allocation7 + $0x10] sm:$0xff]  }
  0x4c   :  { %530 = vmatpush3.bf16.msra.mxu0 %v600_v1  ;;  %550 = vmatpush3.bf16.msra.mxu1 %v609_v4  ;;  %v605_v9 = vld [vmem:[#allocation5 + $0x28] sm:$0xff]   ;;  %v612_v10 = vld [vmem:[#allocation7 + $0x18] sm:$0xff]   ;;  %v606_v11 = vld [vmem:[#allocation5 + $0x30] sm:$0xff]  }
  0x4d   :  { %531 = vmatprep.subr.bf16.mxu0 %v757_v0  ;;  %551 = vmatprep.subr.bf16.mxu1 %v757_v0  ;;  %v613_v12 = vld [vmem:[#allocation7 + $0x20] sm:$0xff]   ;;  %v607_v13 = vld [vmem:[#allocation5 + $0x38] sm:$0xff]   ;;  %v614_v14 = vld [vmem:[#allocation7 + $0x28] sm:$0xff]  }
  0x4e   :  { %v608_v15 = vld [vmem:[#allocation2] sm:$0xff]   ;;  %v615_v16 = vld [vmem:[#allocation7 + $0x30] sm:$0xff]   ;;  %v617_v18 = vld [vmem:[#allocation8] sm:$0xff]  }
  0x4f   :  { %v616_v17 = vld [vmem:[#allocation7 + $0x38] sm:$0xff]   ;;  %v618_v19 = vld [vmem:[#allocation8 + $0x8] sm:$0xff]   ;;  %v619_v20 = vld [vmem:[#allocation8 + $0x10] sm:$0xff]  }
  0x50   :  { %532 = vmatpush3.bf16.msra.mxu0 %v601_v2  ;;  %552 = vmatpush3.bf16.msra.mxu1 %v610_v6  ;;  %v620_v21 = vld [vmem:[#allocation8 + $0x18] sm:$0xff]   ;;  %v621_v22 = vld [vmem:[#allocation8 + $0x20] sm:$0xff]   ;;  %v622_v23 = vld [vmem:[#allocation8 + $0x28] sm:$0xff]  }
  0x51   :  { %533 = vmatprep.subr.bf16.mxu0 %v757_v0  ;;  %553 = vmatprep.subr.bf16.mxu1 %v757_v0  ;;  %v474_v24 = vld [vmem:[%s929_s2] ss:$0 sm:$0xff]  ;;  %v623_v34 = vld [vmem:[#allocation8 + $0x30] sm:$0xff]  }
  0x52   :  { %v624_v35 = vld [vmem:[#allocation8 + $0x38] sm:$0xff]  }
  0x53   :  { %v484_v36 = vld [vmem:[%s931_s4] ss:$0 sm:$0xff]  ;;  %s759_s4 = smov [#allocation10]  }
  0x54   :  { %534 = vmatpush3.bf16.msra.mxu0 %v602_v3  ;;  %554 = vmatpush3.bf16.msra.mxu1 %v611_v8  ;;  %v493_v46 = vld [vmem:[%s933_s6] ss:$0 sm:$0xff]  ;;  %s460_s6 = sshll.u32 %s759_s4, 4  ;;  %s461_s6 = int_to_ptr.vmem [resolvable:$true] %s460_s6 }
  0x55   :  { %535 = vmatprep.subr.bf16.mxu0 %v757_v0  ;;  %555 = vmatprep.subr.bf16.mxu1 %v757_v0  ;;  %s721_s29 = scalar_lea.vmem %s461_s6, 256  ;;  %p726_p5 = scmp.lt.s32.totalorder %s461_s6, %s461_s6 }
  0x56   :  { %p722_p4 = scmp.ne.s32.totalorder %s461_s6, %s721_s29  ;;  %p727_p6 = scmp.lt.s32.totalorder %s721_s29, %s721_s29 }
  0x58   :  { %536 = vmatpush3.bf16.msra.mxu0 %v603_v5  ;;  %556 = vmatpush3.bf16.msra.mxu1 %v612_v10  ;;  %p728_p7 = por %p727_p6, %p726_p5 }
  0x59   :  { %537 = vmatprep.subr.bf16.mxu0 %v757_v0  ;;  %557 = vmatprep.subr.bf16.mxu1 %v757_v0 }
  0x5a   :  { %p729_p8 = pnand %p728_p7, %p722_p4 }
  0x5c   :  { %538 = vmatpush3.bf16.msra.mxu0 %v604_v7  ;;  %558 = vmatpush3.bf16.msra.mxu1 %v613_v12 }
  0x5d   :  { %539 = vmatprep.subr.bf16.mxu0 %v757_v0  ;;  %559 = vmatprep.subr.bf16.mxu1 %v757_v0 }
  0x60   :  { %540 = vmatpush3.bf16.msra.mxu0 %v605_v9  ;;  %560 = vmatpush3.bf16.msra.mxu1 %v614_v14 }
  0x61   :  { %541 = vmatprep.subr.bf16.mxu0 %v757_v0  ;;  %561 = vmatprep.subr.bf16.mxu1 %v757_v0 }
  0x64   :  { %542 = vmatpush3.bf16.msra.mxu0 %v606_v11  ;;  %562 = vmatpush3.bf16.msra.mxu1 %v615_v16 }
  0x65   :  { %543 = vmatprep.subr.bf16.mxu0 %v757_v0  ;;  %563 = vmatprep.subr.bf16.mxu1 %v757_v0 }
  0x68   :  { %544 = vmatpush3.bf16.msra.mxu0 %v607_v13  ;;  %564 = vmatpush3.bf16.msra.mxu1 %v616_v17 }
  0x69   :  { %569 = vmatprep.subr.bf16.mxu0 %v757_v0 }
  0x6b   :  { %546 = vmatmul.mubr.bf16.vlgmr.msra.gmra.mrb[0].mxu0 %v608_v15 }
  0x6c   :  { %585 = vmatprep.mubr.msk.bf16.mxu0 %vm758_vm0, %v757_v0  ;;  %570 = vmatpush3.bf16.msra.mxu0 %v617_v18 }
  0x6d   :  { %571 = vmatprep.subr.bf16.mxu0 %v757_v0 }
  0x70   :  { %572 = vmatpush3.bf16.msra.mxu0 %v618_v19 }
  0x71   :  { %573 = vmatprep.subr.bf16.mxu0 %v757_v0 }
  0x74   :  { %574 = vmatpush3.bf16.msra.mxu0 %v619_v20 }
  0x75   :  { %575 = vmatprep.subr.bf16.mxu0 %v757_v0 }
  0x78   :  { %576 = vmatpush3.bf16.msra.mxu0 %v620_v21 }
  0x79   :  { %577 = vmatprep.subr.bf16.mxu0 %v757_v0 }
  0x7c   :  { %578 = vmatpush3.bf16.msra.mxu0 %v621_v22 }
  0x7d   :  { %579 = vmatprep.subr.bf16.mxu0 %v757_v0 }
  0x80   :  { %580 = vmatpush3.bf16.msra.mxu0 %v622_v23 }
  0x81   :  { %581 = vmatprep.subr.bf16.mxu0 %v757_v0 }
  0x84   :  { %582 = vmatpush3.bf16.msra.mxu0 %v623_v34 }
  0x85   :  { %583 = vmatprep.subr.bf16.mxu0 %v757_v0 }
  0x88   :  { %584 = vmatpush3.bf16.msra.mxu0 %v624_v35 }
 0x13e   :  { %v196_v25 = vpop.f32.mrb[0].mxu0 }
 0x13f   :  { %v197_v26 = vadd.f32 %v474_v24, %v196_v25  ;;  %v547_v27 = vpop.f32.mrb[1].mxu0 }
 0x140   :  { %v199_v28 = vpop.f32.mrb[2].mxu0 }
 0x141   :  { %v200_v29 = vadd.f32 %v474_v24, %v199_v28  ;;  %v548_v30 = vpop.f32.mrb[3].mxu0  ;;  %v203_v31 = vmax.f32 %v197_v26, 0.0 }
 0x143   :  { %v204_v32 = vmax.f32 %v200_v29, 0.0 }
 0x145   :  { %v205_v33 = vpack.c.bf16 %v204_v32, %v203_v31 }
 0x147   :  { %566 = vmatmul.mubr.bf16.vlgmr.msra.gmra.mrb[0].mxu1 %v205_v33 }
 0x21a   :  { %v311_v37 = vpop.f32.mrb[0].mxu1 }
 0x21b   :  { %v312_v38 = vadd.f32 %v484_v36, %v311_v37  ;;  %v567_v39 = vpop.f32.mrb[1].mxu1 }
 0x21c   :  { %v314_v40 = vpop.f32.mrb[2].mxu1 }
 0x21d   :  { %v315_v41 = vadd.f32 %v484_v36, %v314_v40  ;;  %v568_v42 = vpop.f32.mrb[3].mxu1  ;;  %v318_v43 = vmax.f32 %v312_v38, 0.0 }
 0x21f   :  { %v319_v44 = vmax.f32 %v315_v41, 0.0 }
 0x221   :  { %v320_v45 = vpack.c.bf16 %v319_v44, %v318_v43 }
 0x223   :  { %586 = vmatmul.mubr.bf16.vlgmr.msra.gmra.mrb[4].mxu0 %v320_v45 }
 0x2f6   :  { %v426_v47 = vpop.f32.mrb[4].mxu0 }
 0x2f7   :  { %v427_v48 = vadd.f32 %v493_v46, %v426_v47  ;;  %v587_v49 = vpop.f32.mrb[5].mxu0 }
 0x2f8   :  { %v429_v50 = vpop.f32.mrb[6].mxu0 }
 0x2f9   :  { %433 = vmax.xlane.f32.xlu0 %v427_v48  ;;  %v588_v51 = vpop.f32.mrb[7].mxu0  ;;  %v430_v52 = vadd.f32 %v493_v46, %v429_v50 }
 0x2fd   :  { %435 = vmax.xlane.f32.xlu0 %v430_v52 }
 0x386   :  { %v434_v53 = vpop.xlane.xlu0 %433 }
 0x387   :  { %v437_v54 = vsub.f32 %v427_v48, %v434_v53 }
 0x389   :  { %v439_v55 = vmul.f32 1.442695, %v437_v54 }
 0x38a   :  { %v436_v56 = vpop.xlane.xlu0 %435 }
 0x38b   :  { %v438_v57 = vsub.f32 %v430_v52, %v436_v56  ;;  %625 = vpow2.f32 %v439_v55 }
 0x38d   :  { %v441_v58 = vmul.f32 1.442695, %v438_v57 }
 0x38f   :  { %627 = vpow2.f32 %v441_v58 }
 0x395   :  { %v626_v59 = vpop.eup %625 }
 0x396   :  { %443 = vadd.xlane.f32.xlu1 %v626_v59 }
 0x399   :  { %v628_v60 = vpop.eup %627 }
 0x39a   :  { %445 = vadd.xlane.f32.xlu1 %v628_v60 }
 0x423   :  { %v444_v61 = vpop.xlane.xlu1 %443 }
 0x424   :  { %629 = vlog2.f32 %v444_v61 }
 0x427   :  { %v446_v62 = vpop.xlane.xlu1 %445 }
 0x428   :  { %631 = vlog2.f32 %v446_v62 }
 0x42e   :  { %v630_v63 = vpop.eup %629 }
 0x42f   :  { %v448_v0 = vmul.f32 0.6931472, %v630_v63 }
 0x431   :  { %v451_v1 = vsub.f32 %v437_v54, %v448_v0 }
 0x432   :  { %v632_v2 = vpop.eup %631 }
 0x433   :  { %453 = vst [vmem:[#allocation10] sm:$0xff] %v451_v1  ;;  %v450_v3 = vmul.f32 0.6931472, %v632_v2 }
 0x435   :  { %v452_v4 = vsub.f32 %v438_v57, %v450_v3 }
 0x437   :  { %454 = vst [vmem:[#allocation10 + $0x8] sm:$0xff] %v452_v4 }
 0x438   :  { %732 = shalt.err (!%p729_p8)
}
 0x439   :  { %s733_s9 = scalar_lea.hbm %s934_s7, 256 }
 0x43a   :  { %p734_p9 = scmp.ne.s32.totalorder %s934_s7, %s733_s9  ;;  %p737_p10 = scmp.lt.u32.totalorder %s733_s9, %s934_s7 }
 0x43c   :  { %p739_p11 = pnand %p737_p10, %p734_p9 }
 0x43e   :  { %742 = shalt.err (!%p739_p11)
}
 0x43f   :  { %s760_s16 = smov 128   ;;  %s761_s0 = smov 8  }
 0x440   :  { %466 = dma.vmem_to_hbm [thread:$0]  %s461_s6, 256, %s934_s7, [#allocation4], %s760_s16, %s760_s16, %s761_s0  }
 0x441   :  { %749 = dma.done.wait [#allocation4], 256  }
 0x442   :  { %750 = vsyncadd [#allocation4], 4294967040 }
 0x443   :  { %470 = vsyncpa [#allocation3], 1 }
 0x444   :  { %471 = vsyncpa [#allocation6], 1 }
 0x445   :  { %472 = vsyncpa [#allocation9], 1 }
 0x446   :  { %473 = vsyncpa [#allocation4], 1 }

</bundles_post_ra>
